<compile_context>
chip_gen: v6e
topology: v6e:2x2x1
jax: 0.10.0
libtpu: 0.0.40
codegen_flags: <defaults>
</compile_context>

<pallas_src>
import math
from functools import partial

import jax
import jax.numpy as jnp
from jax.experimental import pallas as pl
from jax.experimental.pallas import tpu as pltpu


def _round_up(x, m):
    return ((x + m - 1) // m) * m


def _interagg3_kernel(x_ref, wt_ref, wclf_t_ref, bclf_ref, comb_ref, cs_ref,
                      *, feat_dim):
    # x_ref: (k_dim, tile_n) fused transposed activations [self; r1; r2; r3].
    x = x_ref[...]
    # combined^T = relu(W_fused^T @ X^T): one K=k_dim matmul, lane-dense output.
    acc = jnp.dot(wt_ref[...], x, preferred_element_type=jnp.float32)
    comb_ref[...] = jnp.maximum(acc, 0.0)
    # center_scores^T = W_clf^T @ self_feats^T + b, reusing rows 0:feat_dim of x
    # (self features stream from HBM exactly once, as part of the fused slab).
    sf_t = x[:feat_dim, :]
    cs = jnp.dot(wclf_t_ref[...], sf_t, preferred_element_type=jnp.float32)
    cs_ref[...] = cs + bclf_ref[...]


def interagg3_forward(features, nodes, r1_feats, r2_feats, r3_feats,
                      weight, w_clf, b_clf, *, tile_n_max=2048,
                      activation_dtype=jnp.float32):
    """JAX/Pallas equivalent of InterAgg3.forward (hot path).

    features : (num_nodes, feat_dim) f32   -- node feature table
    nodes    : (n,) int32                  -- batch node ids
    r*_feats : (n, embed_dim) f32          -- intra-relation aggregator outputs
    weight   : (feat_dim + 3*embed_dim, embed_dim) f32
    w_clf    : (feat_dim, 2) f32 ; b_clf : (2,) f32

    Returns (combined, center_scores): combined is (embed_dim, n), matching
    `F.relu(cat_feats.mm(self.weight)).t()`; center_scores is (n, 2).
    """
    n = int(nodes.shape[0])
    feat_dim = features.shape[1]
    embed_dim = weight.shape[1]
    k_dim = feat_dim + 3 * embed_dim
    assert weight.shape[0] == k_dim

    # Embedding-table gather: tiny per-row DMAs; left to XLA.
    self_feats = features[nodes]

    # Tile size: lane-dense (multiple of 128), large to amortize the ~0.35us
    # per-grid-step overhead, but split into >= 2 tiles whenever possible so
    # v7x's two TensorCores both get work ("parallel" grid axis).  VMEM is not
    # a constraint even at tile_n=2048 (< 8 MiB working set incl. buffers).
    n128 = _round_up(max(n, 1), 128)
    if n128 >= 256:
        tile_n = max(128, min(tile_n_max, _round_up(pl.cdiv(n128, 2), 128)))
    else:
        tile_n = n128
    n_pad = _round_up(max(n, 1), tile_n)
    pad = n_pad - n

    # Single wrapper-side layout pass: fused, transposed activation slab
    # X^T of shape (k_dim, n_pad).  The concatenated activation never exists
    # in the (n, k_dim) orientation; padded columns are zeros (relu(0)=0 /
    # bias-only scores) and are sliced off after the kernel.
    x_t = jnp.concatenate(
        [self_feats.T.astype(activation_dtype),
         r1_feats.T.astype(activation_dtype),
         r2_feats.T.astype(activation_dtype),
         r3_feats.T.astype(activation_dtype)], axis=0)
    if pad:
        x_t = jnp.pad(x_t, ((0, 0), (0, pad)))

    # Pre-transposed, VMEM-resident parameters (MXU operands may be bf16;
    # accumulation, relu and bias add stay f32 -- important on v5e).
    wt = weight.T.astype(activation_dtype)           # (embed_dim, k_dim)
    wclf_t = w_clf.T.astype(activation_dtype)        # (2, feat_dim)
    bclf = b_clf.reshape(2, 1).astype(jnp.float32)   # (2, 1)

    grid = (n_pad // tile_n,)

    itemsize = jnp.dtype(activation_dtype).itemsize
    cost = pl.CostEstimate(
        flops=2 * n_pad * k_dim * embed_dim + 2 * n_pad * feat_dim * 2,
        transcendentals=0,
        bytes_accessed=(itemsize * (n_pad * k_dim + k_dim * embed_dim
                                    + 2 * feat_dim)
                        + 4 * n_pad * (embed_dim + 2) + 4 * 2),
    )

    comb_t, cs_t = pl.pallas_call(
        partial(_interagg3_kernel, feat_dim=feat_dim),
        grid=grid,
        out_shape=(
            jax.ShapeDtypeStruct((embed_dim, n_pad), jnp.float32),
            jax.ShapeDtypeStruct((2, n_pad), jnp.float32),
        ),
        in_specs=[
            pl.BlockSpec((k_dim, tile_n), lambda i: (0, i)),      # X^T (streamed)
            pl.BlockSpec((embed_dim, k_dim), lambda i: (0, 0)),   # W^T (resident)
            pl.BlockSpec((2, feat_dim), lambda i: (0, 0)),        # W_clf^T
            pl.BlockSpec((2, 1), lambda i: (0, 0)),               # b_clf
        ],
        out_specs=(
            pl.BlockSpec((embed_dim, tile_n), lambda i: (0, i)),  # lane-dense
            pl.BlockSpec((2, tile_n), lambda i: (0, i)),          # lane-dense
        ),
        compiler_params=pltpu.CompilerParams(
            dimension_semantics=("parallel",),
        ),
        cost_estimate=cost,
    )(x_t, wt, wclf_t, bclf)

    # Drop zero-padded columns; return in PyTorch's orientation:
    #   combined: (embed_dim, n) == relu(cat @ W).t(); center_scores: (n, 2).
    return comb_t[:, :n], cs_t[:, :n].T


def _xavier_uniform(key, shape):
    fan_in, fan_out = shape
    bound = math.sqrt(6.0 / (fan_in + fan_out))
    return jax.random.uniform(key, shape, jnp.float32, -bound, bound)


def _reference(features, nodes, r1, r2, r3, weight, w_clf, b_clf):
    self_feats = features[nodes]
    cat_feats = jnp.concatenate([self_feats, r1, r2, r3], axis=1)
    ref_combined = jnp.maximum(cat_feats @ weight, 0.0).T
    ref_scores = self_feats @ w_clf + b_clf
    return ref_combined, ref_scores


if __name__ == "__main__":
    # Small shapes consistent with the module's __init__:
    #   feat_dim=32, embed_dim=32, 3 relations -> weight: (32 + 3*32, 32) = (128, 32)
    num_nodes, feat_dim, embed_dim, n_batch = 64, 32, 32, 8

    key = jax.random.PRNGKey(0)
    (k_feat, k_n, k_r1, k_r2, k_r3, k_w, k_clf_w, k_clf_b,
     k_n2, k_s1, k_s2, k_s3) = jax.random.split(key, 12)

    features = jax.random.normal(k_feat, (num_nodes, feat_dim), jnp.float32)
    nodes = jax.random.randint(k_n, (n_batch,), 0, num_nodes, jnp.int32)
    # Synthetic intra-relation aggregator outputs (stand-ins for intra_agg{1,2,3}).
    r1_feats = jax.random.normal(k_r1, (n_batch, embed_dim), jnp.float32)
    r2_feats = jax.random.normal(k_r2, (n_batch, embed_dim), jnp.float32)
    r3_feats = jax.random.normal(k_r3, (n_batch, embed_dim), jnp.float32)

    # Parameters (deterministic, in-script init).
    weight = _xavier_uniform(k_w, (embed_dim * 3 + feat_dim, embed_dim))
    clf_bound = 1.0 / math.sqrt(feat_dim)
    w_clf = jax.random.uniform(k_clf_w, (feat_dim, 2), jnp.float32, -clf_bound, clf_bound)
    b_clf = jax.random.uniform(k_clf_b, (2,), jnp.float32, -clf_bound, clf_bound)

    # ---- f32 path, single tile --------------------------------------------
    combined, center_scores = interagg3_forward(
        features, nodes, r1_feats, r2_feats, r3_feats, weight, w_clf, b_clf)
    jax.block_until_ready((combined, center_scores))

    ref_combined, ref_scores = _reference(
        features, nodes, r1_feats, r2_feats, r3_feats, weight, w_clf, b_clf)
    assert combined.shape == (embed_dim, n_batch)
    assert center_scores.shape == (n_batch, 2)
    assert jnp.allclose(combined, ref_combined, atol=1e-5)
    assert jnp.allclose(center_scores, ref_scores, atol=1e-5)

    # ---- f32 path, multi-tile + padded batch (grid > 1) --------------------
    n2 = 200
    nodes2 = jax.random.randint(k_n2, (n2,), 0, num_nodes, jnp.int32)
    s1 = jax.random.normal(k_s1, (n2, embed_dim), jnp.float32)
    s2 = jax.random.normal(k_s2, (n2, embed_dim), jnp.float32)
    s3 = jax.random.normal(k_s3, (n2, embed_dim), jnp.float32)
    combined2, center_scores2 = interagg3_forward(
        features, nodes2, s1, s2, s3, weight, w_clf, b_clf)
    jax.block_until_ready((combined2, center_scores2))
    ref_combined2, ref_scores2 = _reference(
        features, nodes2, s1, s2, s3, weight, w_clf, b_clf)
    assert combined2.shape == (embed_dim, n2)
    assert center_scores2.shape == (n2, 2)
    assert jnp.allclose(combined2, ref_combined2, atol=1e-5)
    assert jnp.allclose(center_scores2, ref_scores2, atol=1e-5)

    # ---- optional bf16 streaming path (f32 accumulation), loose tolerance --
    combined_bf, center_scores_bf = interagg3_forward(
        features, nodes, r1_feats, r2_feats, r3_feats, weight, w_clf, b_clf,
        activation_dtype=jnp.bfloat16)
    jax.block_until_ready((combined_bf, center_scores_bf))
    assert combined_bf.shape == (embed_dim, n_batch)
    assert jnp.allclose(combined_bf, ref_combined, atol=1e-1)
    assert jnp.allclose(center_scores_bf, ref_scores, atol=1e-1)

    print("KERNEL_OK")
</pallas_src>

<mosaic_0001>
module attributes {stable_mosaic.version = 11 : i64} {
  func.func @_interagg3_kernel(%arg0: i32, %arg1: memref<128x128xf32, #tpu.memory_space<vmem>>, %arg2: memref<32x128xf32, #tpu.memory_space<vmem>>, %arg3: memref<2x32xf32, #tpu.memory_space<vmem>>, %arg4: memref<2x1xf32, #tpu.memory_space<vmem>>, %arg5: memref<32x128xf32, #tpu.memory_space<vmem>>, %arg6: memref<2x128xf32, #tpu.memory_space<vmem>>) attributes {dimension_semantics = [#tpu.dimension_semantics<parallel>], iteration_bounds = array<i64: 1>, scalar_prefetch = 0 : i64, scratch_operands = 0 : i64, tpu.core_type = #tpu.core_type<tc>, window_params = [{transform_indices = @transform_0, window_bounds = array<i64: 128, 128>}, {pipeline_mode = #tpu.pipeline_mode<synchronous>, transform_indices = @transform_1, window_bounds = array<i64: 32, 128>}, {pipeline_mode = #tpu.pipeline_mode<synchronous>, transform_indices = @transform_2, window_bounds = array<i64: 2, 32>}, {pipeline_mode = #tpu.pipeline_mode<synchronous>, transform_indices = @transform_3, window_bounds = array<i64: 2, 1>}, {transform_indices = @transform_4, window_bounds = array<i64: 32, 128>}, {transform_indices = @transform_5, window_bounds = array<i64: 2, 128>}]} {
    %c0 = arith.constant 0 : index
    %c0_0 = arith.constant 0 : index
    %0 = vector.load %arg1[%c0, %c0_0] : memref<128x128xf32, #tpu.memory_space<vmem>>, vector<128x128xf32>
    %c0_1 = arith.constant 0 : index
    %c0_2 = arith.constant 0 : index
    %1 = vector.load %arg2[%c0_1, %c0_2] : memref<32x128xf32, #tpu.memory_space<vmem>>, vector<32x128xf32>
    %cst = arith.constant dense<0.000000e+00> : vector<32x128xf32>
    %2 = tpu.matmul %1, %0, %cst {dimension_numbers = #tpu.dot_dimension_numbers<[1], [0], [0], [1], [0, 0, 1, 1], [], []>} : vector<32x128xf32>, vector<128x128xf32>, vector<32x128xf32> -> vector<32x128xf32>
    %cst_3 = arith.constant 0.000000e+00 : f32
    %3 = vector.broadcast %cst_3 : f32 to vector<32x128xf32>
    %4 = arith.maximumf %2, %3 : vector<32x128xf32>
    %c0_4 = arith.constant 0 : index
    %c0_5 = arith.constant 0 : index
    %5 = vector.load %arg5[%c0_4, %c0_5] : memref<32x128xf32, #tpu.memory_space<vmem>>, vector<32x128xf32>
    tpu.vector_store %arg5[%c0_4, %c0_5], %4 {strides = array<i32>} : memref<32x128xf32, #tpu.memory_space<vmem>>, vector<32x128xf32>,
    %6 = vector.extract_strided_slice %0 {offsets = [0, 0], sizes = [32, 128], strides = [1, 1]} : vector<128x128xf32> to vector<32x128xf32>
    %c0_6 = arith.constant 0 : index
    %c0_7 = arith.constant 0 : index
    %7 = vector.load %arg3[%c0_6, %c0_7] : memref<2x32xf32, #tpu.memory_space<vmem>>, vector<2x32xf32>
    %cst_8 = arith.constant dense<0.000000e+00> : vector<2x128xf32>
    %8 = tpu.matmul %7, %6, %cst_8 {dimension_numbers = #tpu.dot_dimension_numbers<[1], [0], [0], [1], [0, 0, 1, 1], [], []>} : vector<2x32xf32>, vector<32x128xf32>, vector<2x128xf32> -> vector<2x128xf32>
    %c0_9 = arith.constant 0 : index
    %c0_10 = arith.constant 0 : index
    %9 = vector.load %arg4[%c0_9, %c0_10] : memref<2x1xf32, #tpu.memory_space<vmem>>, vector<2x1xf32>
    %10 = vector.broadcast %9 : vector<2x1xf32> to vector<2x128xf32>
    %11 = arith.addf %8, %10 : vector<2x128xf32>
    %c0_11 = arith.constant 0 : index
    %c0_12 = arith.constant 0 : index
    %12 = vector.load %arg6[%c0_11, %c0_12] : memref<2x128xf32, #tpu.memory_space<vmem>>, vector<2x128xf32>
    tpu.vector_store %arg6[%c0_11, %c0_12], %11 {strides = array<i32>} : memref<2x128xf32, #tpu.memory_space<vmem>>, vector<2x128xf32>,
    return
  }
  func.func @transform_0(%arg0: i32) -> (i32, i32) {
    %c0_i32 = arith.constant 0 : i32
    %c0_i32_0 = arith.constant 0 : i32
    return %c0_i32, %arg0 : i32, i32
  }
  func.func @transform_1(%arg0: i32) -> (i32, i32) {
    %c0_i32 = arith.constant 0 : i32
    %c0_i32_0 = arith.constant 0 : i32
    %c0_i32_1 = arith.constant 0 : i32
    return %c0_i32, %c0_i32_0 : i32, i32
  }
  func.func @transform_2(%arg0: i32) -> (i32, i32) {
    %c0_i32 = arith.constant 0 : i32
    %c0_i32_0 = arith.constant 0 : i32
    %c0_i32_1 = arith.constant 0 : i32
    return %c0_i32, %c0_i32_0 : i32, i32
  }
  func.func @transform_3(%arg0: i32) -> (i32, i32) {
    %c0_i32 = arith.constant 0 : i32
    %c0_i32_0 = arith.constant 0 : i32
    %c0_i32_1 = arith.constant 0 : i32
    return %c0_i32, %c0_i32_0 : i32, i32
  }
  func.func @transform_4(%arg0: i32) -> (i32, i32) {
    %c0_i32 = arith.constant 0 : i32
    %c0_i32_0 = arith.constant 0 : i32
    return %c0_i32, %arg0 : i32, i32
  }
  func.func @transform_5(%arg0: i32) -> (i32, i32) {
    %c0_i32 = arith.constant 0 : i32
    %c0_i32_0 = arith.constant 0 : i32
    return %c0_i32, %arg0 : i32, i32
  }
}

</mosaic_0001>

<bundles_post_ra>
// kernel: tpu_custom_call.1
= control target key start
LH: loop header
LB: loop body
LE: loop exit
PB: predicated region body
PF: predicated region fallthrough
CT: control target
= control target key end

     0   :  { %11 = vsyncpa [#allocation3], 0  ;;  %s515_s0 = inlined_call_operand.hbm [shape: f32[128,128], index: 0, kind: input, shape index: {}]   ;;  %s516_s1 = inlined_call_operand.hbm [shape: f32[32,128], index: 1, kind: input, shape index: {}]   ;;  %s517_s2 = inlined_call_operand.vmem [shape: f32[2,32], index: 2, kind: input, shape index: {}]   ;;  %s518_s3 = inlined_call_operand.vmem [shape: f32[2,1], index: 3, kind: input, shape index: {}]   ;;  %s519_s4 = inlined_call_operand.hbm [shape: f32[32,128], index: 4, kind: output, shape index: {0}]   ;;  %s520_s5 = inlined_call_operand.hbm [shape: f32[2,128], index: 5, kind: output, shape index: {1}]  }
   0x1   :  { %12 = vsyncpa [#allocation6], 0 }
   0x2   :  { %13 = vsyncpa [#allocation4], 0 }
   0x3   :  { %14 = vsyncpa [#allocation9], 0  ;;  %s449_s18 = smov [#allocation2]  }
   0x4   :  { %s20_s19 = sshll.u32 %s449_s18, 4  ;;  %s21_s19 = int_to_ptr.vmem [resolvable:$true] %s20_s19 }
   0x5   :  { %s369_s20 = scalar_lea.vmem %s21_s19, 2048  ;;  %p374_p1 = scmp.lt.s32.totalorder %s21_s19, %s21_s19 }
   0x6   :  { %p370_p0 = scmp.ne.s32.totalorder %s21_s19, %s369_s20  ;;  %p375_p2 = scmp.lt.s32.totalorder %s369_s20, %s369_s20 }
   0x8   :  { %p376_p3 = por %p375_p2, %p374_p1 }
   0xa   :  { %p377_p4 = pnand %p376_p3, %p370_p0 }
   0xc   :  { %380 = shalt.err (!%p377_p4)
}
   0xd   :  { %s450_s21 = smov 128   ;;  %s451_s22 = smov 8  }
   0xe   :  { %26 = dma.hbm_to_vmem [thread:$0]  %s515_s0, 2048, %s21_s19, [#allocation3], %s450_s21, %s450_s21, %s451_s22  }
   0xf   :  { %s452_s25 = smov [#allocation5]  }
  0x10   :  { %s32_s26 = sshll.u32 %s452_s25, 4  ;;  %s33_s26 = int_to_ptr.vmem [resolvable:$true] %s32_s26 }
  0x11   :  { %s389_s27 = scalar_lea.vmem %s33_s26, 512  ;;  %p394_p6 = scmp.lt.s32.totalorder %s33_s26, %s33_s26 }
  0x12   :  { %p390_p5 = scmp.ne.s32.totalorder %s33_s26, %s389_s27  ;;  %p395_p7 = scmp.lt.s32.totalorder %s389_s27, %s389_s27 }
  0x14   :  { %p396_p8 = por %p395_p7, %p394_p6 }
  0x16   :  { %p397_p9 = pnand %p396_p8, %p390_p5 }
  0x18   :  { %400 = shalt.err (!%p397_p9)
}
  0x19   :  { %38 = dma.hbm_to_vmem [thread:$0]  %s516_s1, 512, %s33_s26, [#allocation6], %s450_s21, %s450_s21, %s451_s22  }
  0x1a   :  { %441 = dma.done.wait [#allocation3], 2048  }
  0x1b   :  { %442 = vsyncadd [#allocation3], 4294965248 }
  0x1c   :  { %443 = dma.done.wait [#allocation6], 512  }
  0x1d   :  { %444 = vsyncadd [#allocation6], 4294966784  ;;  %v453_v0 = vmov 0.0   ;;  %vm454_vm0 = vmmov 0   ;;  %v455_v1 = vmov 0   ;;  %v64_v2 = vld [vmem:[#allocation2 + $0x78] sm:$0xff] }
  0x1e   :  { %340 = vmatprep.subr.mxu1 %v453_v0  ;;  %348 = vmatprep.mubr.msk.f32.mxu1 %vm454_vm0, %v453_v0  ;;  %v63_v3 = vld [vmem:[#allocation2 + $0x70] sm:$0xff]  ;;  %v62_v4 = vld [vmem:[#allocation2 + $0x68] sm:$0xff]  ;;  %v61_v5 = vld [vmem:[#allocation2 + $0x60] sm:$0xff]  ;;  %vm169_vm1 = vcmask 261120  }
  0x1f   :  { %360 = vset.pattern.permute.xlu0 %v455_v1  ;;  %302 = vmatprep.subr.mxu0 %v64_v2  ;;  %v52_v6 = vld [vmem:[#allocation2 + $0x18] sm:$0xff]  ;;  %v65_v7 = vld [vmem:[#allocation5] sm:$0xff]  ;;  %v51_v9 = vld [vmem:[#allocation2 + $0x10] sm:$0xff] }
  0x20   :  { %303 = vmatpush3.msra.mxu0 %v64_v2  ;;  %341 = vmatpush3.msra.mxu1 %v52_v6  ;;  %v60_v8 = vld [vmem:[#allocation2 + $0x58] sm:$0xff]  ;;  %v59_v10 = vld [vmem:[#allocation2 + $0x50] sm:$0xff]  ;;  %v50_v11 = vld [vmem:[#allocation2 + $0x8] sm:$0xff] }
  0x21   :  { %304 = vmatprep.subr.mxu0 %v63_v3  ;;  %342 = vmatprep.subr.mxu1 %v453_v0  ;;  %v58_v12 = vld [vmem:[#allocation2 + $0x48] sm:$0xff]  ;;  %v162_v13 = vld [vmem:[%s517_s2] sm:$0x3]  ;;  %v56_v17 = vld [vmem:[#allocation2 + $0x38] sm:$0xff]  ;;  %s456_s2 = smov [#allocation8]  }
  0x22   :  { %305 = vmatpush3.msra.mxu0 %v63_v3  ;;  %334 = vmatprep.mubr.f32.mxu0 %v65_v7  ;;  %v49_v14 = vld [vmem:[#allocation2] sm:$0xff]  ;;  %v55_v18 = vld [vmem:[#allocation2 + $0x30] sm:$0xff]  ;;  %v54_v19 = vld [vmem:[#allocation2 + $0x28] sm:$0xff] }
  0x23   :  { %306 = vmatprep.subr.mxu0 %v62_v4  ;;  %343 = vmatpush3.msra.mxu1 %v51_v9  ;;  %v163_v15 = vld [vmem:[%s518_s3] sm:$0x3]  ;;  %v66_v21 = vld [vmem:[#allocation5 + $0x8] sm:$0xff]  ;;  %v67_v22 = vld [vmem:[#allocation5 + $0x10] sm:$0xff]  ;;  %s262_s3 = sshll.u32 %s456_s2, 4  ;;  %s263_s3 = int_to_ptr.vmem [resolvable:$true] %s262_s3 }
  0x24   :  { %307 = vmatpush3.msra.mxu0 %v62_v4  ;;  %344 = vmatprep.subr.mxu1 %v453_v0  ;;  %v57_v16 = vld [vmem:[#allocation2 + $0x40] sm:$0xff]  ;;  %v68_v23 = vld [vmem:[#allocation5 + $0x18] sm:$0xff]  ;;  %s401_s7 = scalar_lea.vmem %s263_s3, 32  ;;  %p406_p11 = scmp.lt.s32.totalorder %s263_s3, %s263_s3 }
  0x25   :  { %308 = vmatprep.subr.mxu0 %v61_v5  ;;  %345 = vmatpush3.msra.mxu1 %v50_v11  ;;  %v53_v20 = vld [vmem:[#allocation2 + $0x20] sm:$0xff]  ;;  %p402_p10 = scmp.ne.s32.totalorder %s263_s3, %s401_s7  ;;  %p407_p12 = scmp.lt.s32.totalorder %s401_s7, %s401_s7 }
  0x26   :  { %309 = vmatpush3.msra.mxu0 %v61_v5  ;;  %346 = vmatprep.subr.mxu1 %v453_v0 }
  0x27   :  { %310 = vmatprep.subr.mxu0 %v60_v8  ;;  %347 = vmatpush3.msra.mxu1 %v49_v14  ;;  %p408_p13 = por %p407_p12, %p406_p11 }
  0x28   :  { %311 = vmatpush3.msra.mxu0 %v60_v8  ;;  %349 = vmatmul.mubr.msk.f32.vlgmr.msra.gmra.mxu1 %vm169_vm1, %v162_v13 }
  0x29   :  { %312 = vmatprep.subr.mxu0 %v59_v10  ;;  %166 = vperm.xlu0 %360, %v163_v15   ;;  %p409_p0 = pnand %p408_p13, %p402_p10 }
  0x2a   :  { %313 = vmatpush3.msra.mxu0 %v59_v10 }
  0x2b   :  { %314 = vmatprep.subr.mxu0 %v58_v12 }
  0x2c   :  { %315 = vmatpush3.msra.mxu0 %v58_v12 }
  0x2d   :  { %316 = vmatprep.subr.mxu0 %v57_v16 }
  0x2e   :  { %317 = vmatpush3.msra.mxu0 %v57_v16 }
  0x2f   :  { %318 = vmatprep.subr.mxu0 %v56_v17 }
  0x30   :  { %319 = vmatpush3.msra.mxu0 %v56_v17 }
  0x31   :  { %320 = vmatprep.subr.mxu0 %v55_v18 }
  0x32   :  { %321 = vmatpush3.msra.mxu0 %v55_v18 }
  0x33   :  { %322 = vmatprep.subr.mxu0 %v54_v19 }
  0x34   :  { %323 = vmatpush3.msra.mxu0 %v54_v19 }
  0x35   :  { %324 = vmatprep.subr.mxu0 %v53_v20 }
  0x36   :  { %325 = vmatpush3.msra.mxu0 %v53_v20 }
  0x37   :  { %326 = vmatprep.subr.mxu0 %v52_v6 }
  0x38   :  { %327 = vmatpush3.msra.mxu0 %v52_v6 }
  0x39   :  { %328 = vmatprep.subr.mxu0 %v51_v9 }
  0x3a   :  { %329 = vmatpush3.msra.mxu0 %v51_v9 }
  0x3b   :  { %330 = vmatprep.subr.mxu0 %v50_v11 }
  0x3c   :  { %331 = vmatpush3.msra.mxu0 %v50_v11 }
  0x3d   :  { %332 = vmatprep.subr.mxu0 %v49_v14 }
  0x3e   :  { %333 = vmatpush3.msra.mxu0 %v49_v14 }
  0x3f   :  { %335 = vmatmul.mubr.f32.vlgmr.msra.gmra.mxu0 %v66_v21 }
  0x40   :  { %337 = vmatprep.mubr.f32.mxu0 %v67_v22 }
  0x43   :  { %338 = vmatmul.mubr.f32.gmra.mxu0 %v68_v23 }
  0xa4   :  { %v167_v24 = vpop.permute.xlu0 %166 }
  0xe8   :  { %v239_v25 = vpop.f32.mrf.mxu1 }
  0xe9   :  { %v240_v26 = vadd.f32 %v239_v25, %v167_v24 }
  0xea   :  { %v350_v27 = vpop.f32.mrf.mxu1 }
  0xeb   :  { %243 = vst [vmem:[#allocation8] sm:$0x3] %v240_v26 }
  0xec   :  { %412 = shalt.err (!%p409_p0)
}
  0xed   :  { %265 = dma.vmem_to_hbm [thread:$0]  %s263_s3, 32, %s520_s5, [#allocation9]  }
  0xee   :  { %s457_s10 = smov [#allocation7]  }
  0xef   :  { %s249_s11 = sshll.u32 %s457_s10, 4  ;;  %s250_s11 = int_to_ptr.vmem [resolvable:$true] %s249_s11 }
  0xf0   :  { %s421_s12 = scalar_lea.vmem %s250_s11, 512  ;;  %p426_p2 = scmp.lt.s32.totalorder %s250_s11, %s250_s11 }
  0xf1   :  { %p422_p1 = scmp.ne.s32.totalorder %s250_s11, %s421_s12  ;;  %p427_p3 = scmp.lt.s32.totalorder %s421_s12, %s421_s12 }
  0xf3   :  { %p428_p4 = por %p427_p3, %p426_p2 }
  0xf5   :  { %p429_p5 = pnand %p428_p4, %p422_p1 }
  0xff   :  { %v336_v28 = vpop.f32.mrf.mxu0 }
 0x100   :  { %v155_v29 = vmax.f32 %v336_v28, 0.0 }
 0x101   :  { %v135_v30 = vpop.f32.mrf.mxu0 }
 0x102   :  { %159 = vst [vmem:[#allocation7 + $0x8] sm:$0xff] %v155_v29  ;;  %v154_v31 = vmax.f32 %v135_v30, 0.0 }
 0x103   :  { %v339_v32 = vpop.f32.mrf.mxu0 }
 0x104   :  { %158 = vst [vmem:[#allocation7] sm:$0xff] %v154_v31  ;;  %v157_v33 = vmax.f32 %v339_v32, 0.0 }
 0x105   :  { %v145_v34 = vpop.f32.mrf.mxu0 }
 0x106   :  { %161 = vst [vmem:[#allocation7 + $0x18] sm:$0xff] %v157_v33  ;;  %v156_v35 = vmax.f32 %v145_v34, 0.0 }
 0x108   :  { %160 = vst [vmem:[#allocation7 + $0x10] sm:$0xff] %v156_v35 }
 0x109   :  { %432 = shalt.err (!%p429_p5)
}
 0x10a   :  { %255 = dma.vmem_to_hbm [thread:$0]  %s250_s11, 512, %s519_s4, [#allocation4], %s450_s21, %s450_s21, %s451_s22  }
 0x10b   :  { %445 = dma.done.wait [#allocation4], 512  }
 0x10c   :  { %446 = vsyncadd [#allocation4], 4294966784 }
 0x10d   :  { %447 = dma.done.wait [#allocation9], 32  }
 0x10e   :  { %448 = vsyncadd [#allocation9], 4294967264 }
 0x10f   :  { %272 = vsyncpa [#allocation3], 1 }
 0x110   :  { %273 = vsyncpa [#allocation6], 1 }
 0x111   :  { %274 = vsyncpa [#allocation4], 1 }
 0x112   :  { %275 = vsyncpa [#allocation9], 1 }

</bundles_post_ra>
